<compile_context>
chip_gen: v5e
topology: v5e:2x2
jax: 0.10.0
libtpu: 0.0.40
codegen_flags: <defaults>
</compile_context>

<pallas_src>
import math

import jax
import jax.numpy as jnp
from jax import lax
from jax.experimental import pallas as pl
from jax.experimental.pallas import tpu as pltpu
import numpy as np


def _round_up(x, m):
    return (x + m - 1) // m * m


def _vmem_capacity():
    """Physical per-core VMEM of the local TPU generation (bytes)."""
    try:
        return int(pltpu.get_tpu_info().vmem_capacity_bytes)
    except Exception:
        return 64 * 1024 * 1024  # conservative default (v7x per-TensorCore VMEM)


def _compiler_params(dim_semantics, vmem_need_bytes, vmem_cap_bytes):
    # Only raise the scoped-VMEM limit when the working set needs it, and never
    # above the physical per-core VMEM of this generation (64 MiB on v7x).
    kw = dict(dimension_semantics=dim_semantics)
    if vmem_need_bytes > 16 * 1024 * 1024:
        kw["vmem_limit_bytes"] = int(min(2 * vmem_need_bytes,
                                         vmem_cap_bytes - 8 * 1024 * 1024))
    return pltpu.CompilerParams(**kw)


def _pick_tb(Bp, target=256):
    """Batch rows per recurrent block: as large as the MXU height allows,
    but split into >=2 blocks (megacore) when the batch is big enough.
    Keeps TB a multiple of 16 (bf16 sublane tile) unless TB == Bp."""
    if Bp <= 16:
        return Bp
    cand = min(target, Bp // 2)
    cand -= cand % 16
    while cand >= 16 and Bp % cand != 0:
        cand -= 16
    return cand if cand >= 16 else Bp


# ---------------------------------------------------------------------------
# Stage 1: batched (no time dependence) LayerNorm + GELU + input projection.
# ---------------------------------------------------------------------------
def _ln_gelu_proj_kernel(x_ref, gamma_ref, beta_ref, wih_ref, bias_ref, gi_ref):
    """gi = GELU(LayerNorm(x)) @ W_ih^T + bias for a tile of (T*B) rows."""
    x = x_ref[...].astype(jnp.float32)                         # (RN, I)

    # LayerNorm over the feature dim (eps matches nn.LayerNorm default).
    mean = jnp.mean(x, axis=-1, keepdims=True)
    var = jnp.mean((x - mean) * (x - mean), axis=-1, keepdims=True)
    xn = (x - mean) * lax.rsqrt(var + 1e-5)
    xn = xn * gamma_ref[...] + beta_ref[...]                   # gamma/beta: (1, I)

    # Exact GELU (PyTorch F.gelu default: erf formulation).
    inv_sqrt2 = jnp.float32(1.0 / math.sqrt(2.0))
    g = 0.5 * xn * (1.0 + lax.erf(xn * inv_sqrt2))

    # One large bf16 MXU matmul (f32 accumulation), bias folded in; the
    # intermediate is stored in bf16 to halve Stage-1->Stage-2 HBM traffic.
    gi = jnp.dot(g.astype(jnp.bfloat16), wih_ref[...],
                 preferred_element_type=jnp.float32) + bias_ref[...]
    gi_ref[...] = gi.astype(gi_ref.dtype)


# ---------------------------------------------------------------------------
# Stage 2: sequential GRU.  Only h @ W_hh + gate math remains in the loop.
# ---------------------------------------------------------------------------
def _gru_scan_kernel(gi_ref, whh_ref, bhn_ref, out_ref, h_ref):
    """Processes TT timesteps per grid step; h carried in VMEM scratch.

    gi_ref : (TT, TB, 3*Hp) bf16  precomputed input projection (+ fused biases)
    whh_ref: (Hp, 3*Hp)     bf16  recurrent weights
    bhn_ref: (1, Hp)        f32   n-gate part of b_hh (multiplied by r)
    out_ref: (TT, TB, Hp)         hidden states
    h_ref  : (TB, Hp)       f32   carried hidden state (scratch)
    """
    TT, TB, _ = gi_ref.shape
    Hp = h_ref.shape[-1]

    # PyTorch default h0 = zeros; reinit at the start of every batch block.
    @pl.when(pl.program_id(1) == 0)
    def _():
        h_ref[...] = jnp.zeros_like(h_ref)

    # Hoist the n-gate recurrent bias broadcast out of the time loop
    # (JAX does not CSE broadcast_in_dim).
    bhn = jnp.broadcast_to(bhn_ref[...], (TB, Hp))

    def step(tt, carry):
        h_prev = h_ref[...]                                    # (TB, Hp) f32
        gi_t = gi_ref[tt].astype(jnp.float32)                  # (TB, 3*Hp)
        gh = jnp.dot(h_prev.astype(jnp.bfloat16), whh_ref[...],
                     preferred_element_type=jnp.float32)       # (TB, 3*Hp)
        # PyTorch gate order: r, z, n.  Hp is a multiple of 128, so these
        # slices are vreg/lane aligned (no cross-lane relayout).
        r = jax.nn.sigmoid(gi_t[:, 0:Hp] + gh[:, 0:Hp])
        z = jax.nn.sigmoid(gi_t[:, Hp:2 * Hp] + gh[:, Hp:2 * Hp])
        n = jnp.tanh(gi_t[:, 2 * Hp:3 * Hp] + r * (gh[:, 2 * Hp:3 * Hp] + bhn))
        h_new = (1.0 - z) * n + z * h_prev
        h_ref[...] = h_new
        out_ref[tt] = h_new.astype(out_ref.dtype)
        return carry

    # Partial unroll: enough scheduler slack without blowing up code size /
    # vreg pressure when each gate tensor is (TB, Hp) with large TB.
    lax.fori_loop(0, TT, step, 0, unroll=min(4, TT))
    # Dropout: identity in eval mode (nn.Dropout only acts in training).


# ---------------------------------------------------------------------------
# Wrapper
# ---------------------------------------------------------------------------
def recurrent_block(x, params, *, time_block=16):
    """x: (T, B, I) float32.  Returns (T, B, H)."""
    T, B, I = x.shape
    H = params["w_hh_t"].shape[0]

    Hp = _round_up(H, 128)          # lane-align each gate
    Bp = _round_up(B, 8)            # sublane-align batch

    vmem_cap = _vmem_capacity()
    budget = int(0.55 * vmem_cap)   # working-set budget for tile selection

    # ---- Stage-2 tiling: batch block TB and time block TT ----
    TB = _pick_tb(Bp)
    TT = max(1, min(time_block, T))

    def _vmem_stage2(tt, tb):
        return (2 * tt * tb * 3 * Hp * 2      # gi blocks (bf16, double-buffered)
                + 2 * tt * tb * Hp * 4        # out blocks (f32, double-buffered)
                + tb * Hp * 4                 # carried h scratch
                + 2 * Hp * 3 * Hp * 2         # W_hh (bf16)
                + 2 * Hp * 4)                 # b_hh (n gate)

    while TT > 1 and _vmem_stage2(TT, TB) > budget:
        TT = max(1, TT // 2)

    Tp = _round_up(T, TT)
    total_rows = Tp * Bp

    # ---- Stage-1 tiling: row tile decoupled from (TT, TB) ----
    def _vmem_stage1(rn):
        return (2 * rn * I * 4                # x rows (f32, double-buffered)
                + 2 * rn * 3 * Hp * 2         # gi out (bf16, double-buffered)
                + 2 * I * 3 * Hp * 2          # W_ih (bf16)
                + 4 * (2 * I + 3 * Hp) * 4)   # gamma/beta/bias

    RN = min(total_rows, 1024)
    RN -= RN % 16
    while RN >= 16 and (total_rows % RN != 0 or _vmem_stage1(RN) > budget):
        RN -= 16
    if RN < 16:
        RN = total_rows            # fall back to a single (full) row block

    # ---- pad & repack parameters into a lane-aligned per-gate layout ----
    def pad_gate_cols(w):           # (rows, 3H) -> (rows, 3*Hp)
        parts = [jnp.pad(w[:, g * H:(g + 1) * H], ((0, 0), (0, Hp - H)))
                 for g in range(3)]
        return jnp.concatenate(parts, axis=1)

    def pad_gate_vec(v):            # (H,) -> (Hp,)
        return jnp.pad(v, (0, Hp - H))

    w_ih_p = pad_gate_cols(params["w_ih_t"]).astype(jnp.bfloat16)            # (I, 3Hp)
    w_hh_p = pad_gate_cols(
        jnp.pad(params["w_hh_t"], ((0, Hp - H), (0, 0)))).astype(jnp.bfloat16)  # (Hp, 3Hp)

    b_ih = params["b_ih"]
    b_hh = params["b_hh"]
    # Fold b_ih entirely and the r/z parts of b_hh into the precomputed gi;
    # b_hh_n stays on the recurrent side (it is multiplied by r).
    b_gi = jnp.concatenate([pad_gate_vec(b_ih[0:H] + b_hh[0:H]),
                            pad_gate_vec(b_ih[H:2 * H] + b_hh[H:2 * H]),
                            pad_gate_vec(b_ih[2 * H:3 * H])]).reshape(1, 3 * Hp)
    b_hn = pad_gate_vec(b_hh[2 * H:3 * H]).reshape(1, Hp).astype(jnp.float32)

    gamma = params["ln_gamma"].reshape(1, I)
    beta = params["ln_beta"].reshape(1, I)

    # ---- pad activations (padded rows/steps are discarded at the end) ----
    xp = jnp.pad(x, ((0, Tp - T), (0, Bp - B), (0, 0)))
    x2 = xp.reshape(Tp * Bp, I)                                 # free reshape in XLA

    # ---- Stage 1: large lane-dense matmul over all timesteps (bf16 out) ----
    gi2 = pl.pallas_call(
        _ln_gelu_proj_kernel,
        out_shape=jax.ShapeDtypeStruct((total_rows, 3 * Hp), jnp.bfloat16),
        grid_spec=pltpu.PrefetchScalarGridSpec(
            num_scalar_prefetch=0,
            grid=(total_rows // RN,),
            in_specs=[
                pl.BlockSpec((RN, I), lambda r: (r, 0)),        # x rows
                pl.BlockSpec((1, I), lambda r: (0, 0)),         # ln gamma
                pl.BlockSpec((1, I), lambda r: (0, 0)),         # ln beta
                pl.BlockSpec((I, 3 * Hp), lambda r: (0, 0)),    # W_ih^T (bf16)
                pl.BlockSpec((1, 3 * Hp), lambda r: (0, 0)),    # fused bias
            ],
            out_specs=pl.BlockSpec((RN, 3 * Hp), lambda r: (r, 0)),
        ),
        compiler_params=_compiler_params(("parallel",), _vmem_stage1(RN), vmem_cap),
    )(x2, gamma, beta, w_ih_p, b_gi)
    gi = gi2.reshape(Tp, Bp, 3 * Hp)

    # ---- Stage 2: sequential GRU over time, blocked by (TB batch, TT time) ----
    out_p = pl.pallas_call(
        _gru_scan_kernel,
        out_shape=jax.ShapeDtypeStruct((Tp, Bp, Hp), x.dtype),
        grid_spec=pltpu.PrefetchScalarGridSpec(
            num_scalar_prefetch=0,
            grid=(Bp // TB, Tp // TT),
            in_specs=[
                pl.BlockSpec((TT, TB, 3 * Hp), lambda b, t: (t, b, 0)),  # gi block (bf16)
                pl.BlockSpec((Hp, 3 * Hp), lambda b, t: (0, 0)),         # W_hh^T (bf16)
                pl.BlockSpec((1, Hp), lambda b, t: (0, 0)),              # b_hh (n gate)
            ],
            out_specs=pl.BlockSpec((TT, TB, Hp), lambda b, t: (t, b, 0)),
            scratch_shapes=[pltpu.VMEM((TB, Hp), jnp.float32)],          # carried h
        ),
        compiler_params=_compiler_params(("parallel", "arbitrary"),
                                         _vmem_stage2(TT, TB), vmem_cap),
    )(gi, w_hh_p, b_hn)

    return out_p[:T, :B, :H]


# ---------------------------------------------------------------------------
# Pure-JAX reference (f32) implementing the same PyTorch semantics.
# ---------------------------------------------------------------------------
def recurrent_block_ref(x, params):
    T, B, I = x.shape
    H = params["w_hh_t"].shape[0]
    mean = jnp.mean(x, axis=-1, keepdims=True)
    var = jnp.mean((x - mean) ** 2, axis=-1, keepdims=True)
    xn = (x - mean) * lax.rsqrt(var + 1e-5)
    xn = xn * params["ln_gamma"] + params["ln_beta"]
    g = 0.5 * xn * (1.0 + lax.erf(xn / jnp.sqrt(2.0)))

    def step(h, xt):
        gi = xt @ params["w_ih_t"] + params["b_ih"]
        gh = h @ params["w_hh_t"] + params["b_hh"]
        i_r, i_z, i_n = gi[:, :H], gi[:, H:2 * H], gi[:, 2 * H:]
        h_r, h_z, h_n = gh[:, :H], gh[:, H:2 * H], gh[:, 2 * H:]
        r = jax.nn.sigmoid(i_r + h_r)
        z = jax.nn.sigmoid(i_z + h_z)
        n = jnp.tanh(i_n + r * h_n)
        h_new = (1.0 - z) * n + z * h
        return h_new, h_new

    h0 = jnp.zeros((B, H), jnp.float32)
    _, out = lax.scan(step, h0, g)
    return out


def init_params(key, input_size, hidden_size):
    """Deterministic init mirroring PyTorch shapes (GRU uniform +/- 1/sqrt(H))."""
    k1, k2, k3, k4 = jax.random.split(key, 4)
    bound = 1.0 / math.sqrt(hidden_size)
    # PyTorch stores weight_ih_l0 as (3H, I); we pass the transpose for x @ W^T.
    w_ih = jax.random.uniform(k1, (3 * hidden_size, input_size),
                              jnp.float32, -bound, bound)
    w_hh = jax.random.uniform(k2, (3 * hidden_size, hidden_size),
                              jnp.float32, -bound, bound)
    b_ih = jax.random.uniform(k3, (3 * hidden_size,), jnp.float32, -bound, bound)
    b_hh = jax.random.uniform(k4, (3 * hidden_size,), jnp.float32, -bound, bound)
    return {
        "ln_gamma": jnp.ones((input_size,), jnp.float32),
        "ln_beta": jnp.zeros((input_size,), jnp.float32),
        "w_ih_t": jnp.asarray(w_ih.T),   # (I, 3H)
        "w_hh_t": jnp.asarray(w_hh.T),   # (H, 3H)
        "b_ih": b_ih,
        "b_hh": b_hh,
    }


if __name__ == "__main__":
    T, B, I, H = 8, 4, 32, 32            # seq=8, batch=4, input=32, hidden=32
    key = jax.random.PRNGKey(0)
    kx, kp = jax.random.split(key)
    x = jax.random.normal(kx, (T, B, I), jnp.float32)
    lengths = jnp.full((B,), T, jnp.int32)   # unused by the forward (as in PyTorch)
    params = init_params(kp, I, H)

    out = recurrent_block(x, params)
    out = jax.block_until_ready(out)

    ref = recurrent_block_ref(x, params)
    # bf16 MXU operands + bf16 gi intermediate (f32 accumulation/gate math)
    # -> slightly looser tolerance vs the f32 reference.
    np.testing.assert_allclose(np.asarray(out), np.asarray(ref),
                               rtol=3e-2, atol=3e-2)
    print("KERNEL_OK")
</pallas_src>

<mosaic_0001>
module attributes {stable_mosaic.version = 11 : i64} {
  func.func @_ln_gelu_proj_kernel(%arg0: i32, %arg1: memref<64x32xf32, #tpu.memory_space<vmem>>, %arg2: memref<1x32xf32, #tpu.memory_space<vmem>>, %arg3: memref<1x32xf32, #tpu.memory_space<vmem>>, %arg4: memref<32x384xbf16, #tpu.memory_space<vmem>>, %arg5: memref<1x384xf32, #tpu.memory_space<vmem>>, %arg6: memref<64x384xbf16, #tpu.memory_space<vmem>>) attributes {dimension_semantics = [#tpu.dimension_semantics<parallel>], iteration_bounds = array<i64: 1>, scalar_prefetch = 0 : i64, scratch_operands = 0 : i64, tpu.core_type = #tpu.core_type<tc>, window_params = [{transform_indices = @transform_0, window_bounds = array<i64: 64, 32>}, {pipeline_mode = #tpu.pipeline_mode<synchronous>, transform_indices = @transform_1, window_bounds = array<i64: 1, 32>}, {pipeline_mode = #tpu.pipeline_mode<synchronous>, transform_indices = @transform_2, window_bounds = array<i64: 1, 32>}, {pipeline_mode = #tpu.pipeline_mode<synchronous>, transform_indices = @transform_3, window_bounds = array<i64: 32, 384>}, {pipeline_mode = #tpu.pipeline_mode<synchronous>, transform_indices = @transform_4, window_bounds = array<i64: 1, 384>}, {transform_indices = @transform_5, window_bounds = array<i64: 64, 384>}]} {
    %c0 = arith.constant 0 : index
    %c0_0 = arith.constant 0 : index
    %0 = vector.load %arg1[%c0, %c0_0] : memref<64x32xf32, #tpu.memory_space<vmem>>, vector<64x32xf32>
    %cst = arith.constant dense<0.000000e+00> : vector<64xf32>
    %1 = vector.multi_reduction <add>, %0, %cst [1] : vector<64x32xf32> to vector<64xf32>
    %2 = vector.shape_cast %1 : vector<64xf32> to vector<64x1xf32>
    %cst_1 = arith.constant 3.200000e+01 : f32
    %3 = vector.broadcast %cst_1 : f32 to vector<64x1xf32>
    %4 = arith.divf %2, %3 : vector<64x1xf32>
    %5 = vector.broadcast %4 : vector<64x1xf32> to vector<64x32xf32>
    %6 = arith.subf %0, %5 : vector<64x32xf32>
    %7 = vector.broadcast %4 : vector<64x1xf32> to vector<64x32xf32>
    %8 = arith.subf %0, %7 : vector<64x32xf32>
    %9 = arith.mulf %6, %8 : vector<64x32xf32>
    %cst_2 = arith.constant dense<0.000000e+00> : vector<64xf32>
    %10 = vector.multi_reduction <add>, %9, %cst_2 [1] : vector<64x32xf32> to vector<64xf32>
    %11 = vector.shape_cast %10 : vector<64xf32> to vector<64x1xf32>
    %cst_3 = arith.constant 3.200000e+01 : f32
    %12 = vector.broadcast %cst_3 : f32 to vector<64x1xf32>
    %13 = arith.divf %11, %12 : vector<64x1xf32>
    %14 = vector.broadcast %4 : vector<64x1xf32> to vector<64x32xf32>
    %15 = arith.subf %0, %14 : vector<64x32xf32>
    %cst_4 = arith.constant 9.99999974E-6 : f32
    %16 = vector.broadcast %cst_4 : f32 to vector<64x1xf32>
    %17 = arith.addf %13, %16 : vector<64x1xf32>
    %18 = math.rsqrt %17 : vector<64x1xf32>
    %19 = vector.broadcast %18 : vector<64x1xf32> to vector<64x32xf32>
    %20 = arith.mulf %15, %19 : vector<64x32xf32>
    %c0_5 = arith.constant 0 : index
    %c0_6 = arith.constant 0 : index
    %21 = vector.load %arg2[%c0_5, %c0_6] : memref<1x32xf32, #tpu.memory_space<vmem>>, vector<1x32xf32>
    %22 = vector.broadcast %21 : vector<1x32xf32> to vector<64x32xf32>
    %23 = arith.mulf %20, %22 : vector<64x32xf32>
    %c0_7 = arith.constant 0 : index
    %c0_8 = arith.constant 0 : index
    %24 = vector.load %arg3[%c0_7, %c0_8] : memref<1x32xf32, #tpu.memory_space<vmem>>, vector<1x32xf32>
    %25 = vector.broadcast %24 : vector<1x32xf32> to vector<64x32xf32>
    %26 = arith.addf %23, %25 : vector<64x32xf32>
    %cst_9 = arith.constant 5.000000e-01 : f32
    %27 = vector.broadcast %cst_9 : f32 to vector<64x32xf32>
    %28 = arith.mulf %27, %26 : vector<64x32xf32>
    %cst_10 = arith.constant 0.707106769 : f32
    %29 = vector.broadcast %cst_10 : f32 to vector<64x32xf32>
    %30 = arith.mulf %26, %29 : vector<64x32xf32>
    %31 = math.erf %30 : vector<64x32xf32>
    %cst_11 = arith.constant 1.000000e+00 : f32
    %32 = vector.broadcast %cst_11 : f32 to vector<64x32xf32>
    %33 = arith.addf %32, %31 : vector<64x32xf32>
    %34 = arith.mulf %28, %33 : vector<64x32xf32>
    %35 = arith.truncf %34 : vector<64x32xf32> to vector<64x32xbf16>
    %c0_12 = arith.constant 0 : index
    %c0_13 = arith.constant 0 : index
    %36 = vector.load %arg4[%c0_12, %c0_13] : memref<32x384xbf16, #tpu.memory_space<vmem>>, vector<32x384xbf16>
    %cst_14 = arith.constant dense<0.000000e+00> : vector<64x384xf32>
    %37 = tpu.matmul %35, %36, %cst_14 {dimension_numbers = #tpu.dot_dimension_numbers<[1], [0], [0], [1], [0, 0, 1, 1], [], []>} : vector<64x32xbf16>, vector<32x384xbf16>, vector<64x384xf32> -> vector<64x384xf32>
    %c0_15 = arith.constant 0 : index
    %c0_16 = arith.constant 0 : index
    %38 = vector.load %arg5[%c0_15, %c0_16] : memref<1x384xf32, #tpu.memory_space<vmem>>, vector<1x384xf32>
    %39 = vector.broadcast %38 : vector<1x384xf32> to vector<64x384xf32>
    %40 = arith.addf %37, %39 : vector<64x384xf32>
    %41 = arith.truncf %40 : vector<64x384xf32> to vector<64x384xbf16>
    %c0_17 = arith.constant 0 : index
    %c0_18 = arith.constant 0 : index
    %42 = vector.load %arg6[%c0_17, %c0_18] : memref<64x384xbf16, #tpu.memory_space<vmem>>, vector<64x384xbf16>
    tpu.vector_store %arg6[%c0_17, %c0_18], %41 {strides = array<i32>} : memref<64x384xbf16, #tpu.memory_space<vmem>>, vector<64x384xbf16>,
    return
  }
  func.func @transform_0(%arg0: i32) -> (i32, i32) {
    %c0_i32 = arith.constant 0 : i32
    %c0_i32_0 = arith.constant 0 : i32
    return %arg0, %c0_i32 : i32, i32
  }
  func.func @transform_1(%arg0: i32) -> (i32, i32) {
    %c0_i32 = arith.constant 0 : i32
    %c0_i32_0 = arith.constant 0 : i32
    %c0_i32_1 = arith.constant 0 : i32
    return %c0_i32, %c0_i32_0 : i32, i32
  }
  func.func @transform_2(%arg0: i32) -> (i32, i32) {
    %c0_i32 = arith.constant 0 : i32
    %c0_i32_0 = arith.constant 0 : i32
    %c0_i32_1 = arith.constant 0 : i32
    return %c0_i32, %c0_i32_0 : i32, i32
  }
  func.func @transform_3(%arg0: i32) -> (i32, i32) {
    %c0_i32 = arith.constant 0 : i32
    %c0_i32_0 = arith.constant 0 : i32
    %c0_i32_1 = arith.constant 0 : i32
    return %c0_i32, %c0_i32_0 : i32, i32
  }
  func.func @transform_4(%arg0: i32) -> (i32, i32) {
    %c0_i32 = arith.constant 0 : i32
    %c0_i32_0 = arith.constant 0 : i32
    %c0_i32_1 = arith.constant 0 : i32
    return %c0_i32, %c0_i32_0 : i32, i32
  }
  func.func @transform_5(%arg0: i32) -> (i32, i32) {
    %c0_i32 = arith.constant 0 : i32
    %c0_i32_0 = arith.constant 0 : i32
    return %arg0, %c0_i32 : i32, i32
  }
}

</mosaic_0001>

<bundles_post_ra>
// kernel: tpu_custom_call.1
= control target key start
LH: loop header
LB: loop body
LE: loop exit
PB: predicated region body
PF: predicated region fallthrough
CT: control target
= control target key end

     0   :  { %vm30_vm0 = vcmask 261120   ;;  %s1561_s0 = inlined_call_operand.vmem [shape: f32[64,32], index: 0, kind: input, shape index: {}]   ;;  %s1562_s1 = inlined_call_operand.vmem [shape: f32[1,32], index: 1, kind: input, shape index: {}]   ;;  %s1563_s2 = inlined_call_operand.vmem [shape: f32[1,32], index: 2, kind: input, shape index: {}]   ;;  %s1564_s3 = inlined_call_operand.vmem [shape: bf16[32,384], index: 3, kind: input, shape index: {}]   ;;  %s1565_s4 = inlined_call_operand.vmem [shape: f32[1,384], index: 4, kind: input, shape index: {}]   ;;  %s1566_s5 = inlined_call_operand.hbm [shape: bf16[64,384], index: 5, kind: output, shape index: {}]  }
   0x1   :  { %v26_v0 = vld [vmem:[%s1561_s0 + $0x20] sm:$0xff]  ;;  %v24_v1 = vld [vmem:[%s1561_s0 + $0x10] sm:$0xff]  ;;  %v27_v6 = vld [vmem:[%s1561_s0 + $0x28] sm:$0xff] }
   0x2   :  { %v22_v2 = vld [vmem:[%s1561_s0] sm:$0xff]  ;;  %v43_v3 = vsel %vm30_vm0, %v26_v0, 0.0  ;;  %v37_v4 = vsel %vm30_vm0, %v24_v1, 0.0  ;;  %v25_v7 = vld [vmem:[%s1561_s0 + $0x18] sm:$0xff] }
   0x3   :  { %v31_v5 = vsel %vm30_vm0, %v22_v2, 0.0  ;;  %44 = vadd.xlane.f32.xlu2 %v43_v3  ;;  %38 = vadd.xlane.f32.xlu0 %v37_v4 }
   0x4   :  { %32 = vadd.xlane.f32.xlu1 %v31_v5 }
   0x5   :  { %10 = vsyncpa [#allocation3], 0  ;;  %v23_v8 = vld [vmem:[%s1561_s0 + $0x8] sm:$0xff]  ;;  %v46_v9 = vsel %vm30_vm0, %v27_v6, 0.0  ;;  %v40_v10 = vsel %vm30_vm0, %v25_v7, 0.0  ;;  %v28_v12 = vld [vmem:[%s1561_s0 + $0x30] sm:$0xff] }
   0x6   :  { %v34_v11 = vsel %vm30_vm0, %v23_v8, 0.0  ;;  %v29_v13 = vld [vmem:[%s1561_s0 + $0x38] sm:$0xff]  ;;  %v49_v14 = vsel %vm30_vm0, %v28_v12, 0.0  ;;  %v913_v16 = vmov 32.0   ;;  %s779_s12 = sshll.u32 %s1566_s5, 4  ;;  %s915_s13 = smov 192   ;;  %s780_s12 = int_to_ptr.hbm [resolvable:$true] %s779_s12 }
   0x7   :  { %v52_v15 = vsel %vm30_vm0, %v29_v13, 0.0  ;;  %853 = vrcp.f32 %v913_v16  ;;  %s916_s14 = smov 12  }
   0xb   :  { %47 = vadd.xlane.f32.xlu2 %v46_v9  ;;  %41 = vadd.xlane.f32.xlu0 %v40_v10 }
   0xc   :  { %35 = vadd.xlane.f32.xlu1 %v34_v11 }
   0xd   :  { %v854_v17 = vpop.eup %853 }
   0xe   :  { %v56_v18 = vmul.f32 32.0, %v854_v17  ;;  %vm60_vm1 = vweird.f32 %v854_v17 }
  0x10   :  { %v57_v19 = vsub.f32 1.0, %v56_v18 }
  0x12   :  { %v58_v20 = vmul.f32 %v854_v17, %v57_v19 }
  0x13   :  { %50 = vadd.xlane.f32.xlu0 %v49_v14 }
  0x14   :  { %53 = vadd.xlane.f32.xlu1 %v52_v15  ;;  %v59_v21 = vadd.f32 %v854_v17, %v58_v20 }
  0x16   :  { %v979_v22 = vsel %vm60_vm1, %v854_v17, %v59_v21 }
  0x76   :  { %v45_v23 = vpop.xlane.xlu2 %44  ;;  %v39_v24 = vpop.xlane.xlu0 %38 }
  0x77   :  { %v64_v25 = vmul.f32 %v979_v22, %v39_v24  ;;  %v33_v26 = vpop.xlane.xlu1 %32  ;;  %v66_v36 = vmul.f32 %v979_v22, %v45_v23 }
  0x78   :  { %v62_v27 = vmul.f32 %v979_v22, %v33_v26  ;;  %v813_v26 = vld [vmem:[%s1564_s3 + $0x18] sm:$0xf] }
  0x79   :  { %v983_v28 = vsub.f32 %v24_v1, %v64_v25  ;;  %v1003_v44 = vsub.f32 %v26_v0, %v66_v36 }
  0x7a   :  { %v985_v29 = vsub.f32 %v22_v2, %v62_v27  ;;  %v839_v27 = vld [vmem:[%s1564_s3 + $0x20] sm:$0xf0] }
  0x7b   :  { %v80_v30 = vmul.f32 %v983_v28, %v983_v28  ;;  %v82_v53 = vmul.f32 %v1003_v44, %v1003_v44 }
  0x7c   :  { %v78_v31 = vmul.f32 %v985_v29, %v985_v29 }
  0x7d   :  { %v92_v32 = vsel %vm30_vm0, %v80_v30, 0.0  ;;  %v98_v57 = vsel %vm30_vm0, %v82_v53, 0.0 }
  0x7e   :  { %v48_v33 = vpop.xlane.xlu2 %47  ;;  %93 = vadd.xlane.f32.xlu2 %v92_v32  ;;  %v42_v34 = vpop.xlane.xlu0 %41  ;;  %v86_v35 = vsel %vm30_vm0, %v78_v31, 0.0  ;;  %v814_v32 = vor.u32 %v839_v27, %v813_v26 }
  0x7f   :  { %v67_v37 = vmul.f32 %v979_v22, %v48_v33  ;;  %v65_v38 = vmul.f32 %v979_v22, %v42_v34  ;;  %87 = vadd.xlane.f32.xlu1 %v86_v35  ;;  %v36_v39 = vpop.xlane.xlu1 %35  ;;  %v838_v33 = vld [vmem:[%s1564_s3 + $0x1c] sm:$0xf]  ;;  %v815_v34 = vld [vmem:[%s1564_s3 + $0x24] sm:$0xf0] }
  0x80   :  { %v63_v40 = vmul.f32 %v979_v22, %v36_v39  ;;  %660 = vmatpush.bf16.msra.mxu0 %v814_v32  ;;  %841 = vmatpush.bf16.msra.mxu3 %v814_v32 }
  0x81   :  { %v997_v41 = vsub.f32 %v27_v6, %v67_v37  ;;  %v999_v42 = vsub.f32 %v25_v7, %v65_v38  ;;  %v1066_v38 = vor.u32 %v838_v33, %v815_v34 }
  0x82   :  { %v1001_v43 = vsub.f32 %v23_v8, %v63_v40 }
  0x83   :  { %v81_v45 = vmul.f32 %v999_v42, %v999_v42  ;;  %v83_v46 = vmul.f32 %v997_v41, %v997_v41  ;;  %843 = vmatpush.bf16.msra.mxu1 %v1066_v38 }
  0x84   :  { %v79_v47 = vmul.f32 %v1001_v43, %v1001_v43 }
  0x85   :  { %v95_v48 = vsel %vm30_vm0, %v81_v45, 0.0  ;;  %v101_v49 = vsel %vm30_vm0, %v83_v46, 0.0 }
  0x86   :  { %96 = vadd.xlane.f32.xlu0 %v95_v48  ;;  %v51_v50 = vpop.xlane.xlu0 %50  ;;  %v89_v51 = vsel %vm30_vm0, %v79_v47, 0.0 }
  0x87   :  { %v68_v52 = vmul.f32 %v979_v22, %v51_v50  ;;  %102 = vadd.xlane.f32.xlu1 %v101_v49  ;;  %90 = vadd.xlane.f32.xlu2 %v89_v51  ;;  %v54_v54 = vpop.xlane.xlu1 %53  ;;  %v1090_v51 = vld [vmem:[%s1562_s1] ss:$0 sm:$0xff] }
  0x88   :  { %v69_v55 = vmul.f32 %v979_v22, %v54_v54 }
  0x89   :  { %v1018_v56 = vsub.f32 %v28_v12, %v68_v52 }
  0x8a   :  { %v1023_v59 = vsub.f32 %v29_v13, %v69_v55  ;;  %v821_v55 = vld [vmem:[%s1564_s3 + $0x20] sm:$0xf] }
  0x8b   :  { %v84_v58 = vmul.f32 %v1018_v56, %v1018_v56 }
  0x8c   :  { %v85_v61 = vmul.f32 %v1023_v59, %v1023_v59 }
  0x8d   :  { %v104_v60 = vsel %vm30_vm0, %v84_v58, 0.0 }
  0x8e   :  { %99 = vadd.xlane.f32.xlu0 %v98_v57  ;;  %v107_v62 = vsel %vm30_vm0, %v85_v61, 0.0  ;;  %v801_v61 = vld [vmem:[%s1564_s3] sm:$0xf] }
  0x8f   :  { %105 = vadd.xlane.f32.xlu2 %v104_v60  ;;  %v840_v60 = vld [vmem:[%s1564_s3 + $0x28] sm:$0xf0] }
  0x96   :  { %108 = vadd.xlane.f32.xlu0 %v107_v62  ;;  %v836_v62 = vld [vmem:[%s1564_s3 + $0x8] sm:$0xf0] }
  0xf1   :  { %v94_v63 = vpop.xlane.xlu2 %93 }
  0xf2   :  { %v112_v0 = vmul.f32 %v94_v63, %v979_v22  ;;  %v88_v1 = vpop.xlane.xlu1 %87 }
  0xf3   :  { %v110_v2 = vmul.f32 %v88_v1, %v979_v22 }
  0xf4   :  { %v120_v3 = vadd.f32 1e-05, %v112_v0 }
  0xf5   :  { %v118_v4 = vadd.f32 1e-05, %v110_v2 }
  0xf6   :  { %855 = vrsqrt.f32 %v120_v3  ;;  %vm152_vm5 = vweird.f32 %v120_v3 }
  0xf7   :  { %857 = vrsqrt.f32 %v118_v4  ;;  %vm132_vm2 = vweird.f32 %v118_v4 }
  0xf9   :  { %v97_v5 = vpop.xlane.xlu0 %96 }
  0xfa   :  { %v113_v6 = vmul.f32 %v97_v5, %v979_v22  ;;  %v91_v7 = vpop.xlane.xlu2 %90  ;;  %v103_v8 = vpop.xlane.xlu1 %102 }
  0xfb   :  { %v111_v9 = vmul.f32 %v91_v7, %v979_v22  ;;  %v115_v10 = vmul.f32 %v103_v8, %v979_v22  ;;  %v1131_v7 = vld [vmem:[%s1563_s2] ss:$0 sm:$0xff] }
  0xfc   :  { %v1034_v11 = vpop.eup %855  ;;  %v1036_v12 = vadd.f32 1e-05, %v113_v6 }
  0xfd   :  { %v858_v13 = vpop.eup %857  ;;  %v147_v14 = vmul.f32 %v1034_v11, %v120_v3  ;;  %v1039_v15 = vadd.f32 1e-05, %v111_v9  ;;  %v1041_v16 = vadd.f32 1e-05, %v115_v10  ;;  %vm153_vm3 = vweird.f32 %v1034_v11  ;;  %v835_v3 = vld [vmem:[%s1564_s3 + $0x4] sm:$0xf] }
  0xfe   :  { %v127_v17 = vmul.f32 %v858_v13, %v118_v4  ;;  %859 = vrsqrt.f32 %v1036_v12  ;;  %vm133_vm4 = vweird.f32 %v858_v13  ;;  %vm1079_vm6 = vmor %vm152_vm5, %vm153_vm3  ;;  %vm162_vm8 = vweird.f32 %v1036_v12  ;;  %v803_v4 = vld [vmem:[%s1564_s3 + $0xc] sm:$0xf0] }
  0xff   :  { %v148_v18 = vmul.f32 %v1034_v11, %v147_v14  ;;  %861 = vrsqrt.f32 %v1039_v15  ;;  %vm134_vm7 = vmor %vm132_vm2, %vm133_vm4  ;;  %vm142_vm10 = vweird.f32 %v1039_v15  ;;  %vm182_vm12 = vweird.f32 %v1041_v16 }
 0x100   :  { %v128_v19 = vmul.f32 %v858_v13, %v127_v17  ;;  %863 = vrsqrt.f32 %v1041_v16 }
 0x101   :  { %v149_v20 = vmul.f32 0.5, %v148_v18  ;;  %v100_v21 = vpop.xlane.xlu0 %99  ;;  %v802_v18 = vor.u32 %v836_v62, %v801_v61 }
 0x102   :  { %v129_v23 = vmul.f32 0.5, %v128_v19  ;;  %v114_v24 = vmul.f32 %v100_v21, %v979_v22  ;;  %v106_v25 = vpop.xlane.xlu2 %105  ;;  %v806_v19 = vor.u32 %v835_v3, %v803_v4 }
 0x103   :  { %v150_v30 = vsub.f32 1.5, %v149_v20  ;;  %v116_v31 = vmul.f32 %v106_v25, %v979_v22  ;;  %661 = vmatpush.bf16.msra.mxu0 %v802_v18  ;;  %842 = vmatpush.bf16.msra.mxu3 %v802_v18 }
 0x104   :  { %v1062_v35 = vpop.eup %859  ;;  %v130_v36 = vsub.f32 1.5, %v129_v23  ;;  %v1064_v37 = vadd.f32 1e-05, %v114_v24  ;;  %844 = vmatpush.bf16.msra.mxu1 %v806_v19 }
 0x105   :  { %v1068_v39 = vpop.eup %861  ;;  %v151_v40 = vmul.f32 %v1034_v11, %v150_v30  ;;  %v157_v45 = vmul.f32 %v1062_v35, %v1036_v12  ;;  %v1073_v46 = vadd.f32 1e-05, %v116_v31  ;;  %vm163_vm9 = vweird.f32 %v1062_v35 }
 0x106   :  { %v1075_v47 = vpop.eup %863  ;;  %v131_v49 = vmul.f32 %v858_v13, %v130_v36  ;;  %v137_v50 = vmul.f32 %v1068_v39, %v1039_v15  ;;  %865 = vrsqrt.f32 %v1064_v37  ;;  %vm143_vm11 = vweird.f32 %v1068_v39  ;;  %vm164_vm13 = vmor %vm162_vm8, %vm163_vm9 }
 0x107   :  { %v155_v52 = vsel %vm1079_vm6, %v1034_v11, %v151_v40  ;;  %v158_v53 = vmul.f32 %v1062_v35, %v157_v45  ;;  %v177_v54 = vmul.f32 %v1075_v47, %v1041_v16  ;;  %867 = vrsqrt.f32 %v1073_v46  ;;  %vm144_vm15 = vmor %vm142_vm10, %vm143_vm11  ;;  %689 = vmatpush.bf16.msrb.mxu0 %v1066_v38 }
 0x108   :  { %v135_v57 = vsel %vm134_vm7, %v858_v13, %v131_v49  ;;  %v138_v58 = vmul.f32 %v1068_v39, %v137_v50  ;;  %v208_v5 = vmul.f32 %v155_v52, %v983_v28  ;;  %v1134_v11 = vor.u32 %v840_v60, %v821_v55  ;;  %v809_v28 = vld [vmem:[%s1564_s3 + $0x8] sm:$0xf]  ;;  %v837_v13 = vld [vmem:[%s1564_s3 + $0x10] sm:$0xf0] }
 0x109   :  { %v206_v63 = vmul.f32 %v135_v57, %v985_v29  ;;  %v159_v0 = vmul.f32 0.5, %v158_v53  ;;  %v178_v1 = vmul.f32 %v1075_v47, %v177_v54  ;;  %v109_v2 = vpop.xlane.xlu0 %108  ;;  %vm183_vm14 = vweird.f32 %v1075_v47 }
 0x10a   :  { %v139_v6 = vmul.f32 0.5, %v138_v58  ;;  %v117_v29 = vmul.f32 %v109_v2, %v979_v22  ;;  %845 = vmatpush.bf16.msra.mxu2 %v1134_v11  ;;  %v1158_v25 = vor.u32 %v837_v13, %v809_v28  ;;  %v220_v27 = vmul.f32 %v1090_v51, %v208_v5  ;;  %vm1183_vm1 = vmor %vm182_vm12, %vm183_vm14 }
 0x10b   :  { %v218_v8 = vmul.f32 %v1090_v51, %v206_v63  ;;  %v160_v9 = vsub.f32 1.5, %v159_v0  ;;  %v179_v10 = vmul.f32 0.5, %v178_v1  ;;  %690 = vmatpush.bf16.msrb.mxu0 %v806_v19  ;;  %vm172_vm3 = vweird.f32 %v1064_v37 }
 0x10c   :  { %v1142_v22 = vpop.eup %865  ;;  %v140_v14 = vsub.f32 1.5, %v139_v6  ;;  %v1144_v17 = vadd.f32 1e-05, %v117_v29  ;;  %v1203_v52 = vadd.f32 %v1131_v7, %v220_v27  ;;  %vm192_vm5 = vweird.f32 %v1073_v46 }
 0x10d   :  { %v161_v20 = vmul.f32 %v1062_v35, %v160_v9  ;;  %v180_v21 = vsub.f32 1.5, %v179_v10  ;;  %v167_v23 = vmul.f32 %v1142_v22, %v1064_v37  ;;  %v1160_v26 = vpop.eup %867  ;;  %v1170_v31 = vadd.f32 %v1131_v7, %v218_v8 }
 0x10e   :  { %v141_v24 = vmul.f32 %v1068_v39, %v140_v14  ;;  %869 = vrsqrt.f32 %v1144_v17  ;;  %846 = vmatpush.bf16.msra.mxu2 %v1158_v25  ;;  %vm173_vm2 = vweird.f32 %v1142_v22  ;;  %vm202_vm6 = vweird.f32 %v1144_v17 }
 0x10f   :  { %v165_v30 = vsel %vm164_vm13, %v1062_v35, %v161_v20  ;;  %v168_v12 = vmul.f32 %v1142_v22, %v167_v23  ;;  %v181_v34 = vmul.f32 %v1075_v47, %v180_v21  ;;  %v187_v35 = vmul.f32 %v1160_v26, %v1073_v46  ;;  %vm1224_vm4 = vmor %vm172_vm3, %vm173_vm2 }
 0x110   :  { %v209_v32 = vmul.f32 %v165_v30, %v999_v42  ;;  %v145_v33 = vsel %vm144_vm15, %v1068_v39, %v141_v24  ;;  %v1191_v45 = vmul.f32 0.70710677, %v1170_v31  ;;  %vm193_vm7 = vweird.f32 %v1160_v26 }
 0x111   :  { %v207_v15 = vmul.f32 %v145_v33, %v1001_v43  ;;  %v169_v42 = vmul.f32 0.5, %v168_v12  ;;  %v188_v40 = vmul.f32 %v1160_v26, %v187_v35  ;;  %v185_v48 = vsel %vm1183_vm1, %v1075_v47, %v181_v34  ;;  %vm1267_vm8 = vmor %vm192_vm5, %vm193_vm7 }
 0x112   :  { %v221_v39 = vmul.f32 %v1090_v51, %v209_v32  ;;  %v254_v50 = vmul.f32 %v1191_v45, %v1191_v45  ;;  %v211_v61 = vmul.f32 %v185_v48, %v997_v41  ;;  %v1236_v41 = vmul.f32 0.70710677, %v1203_v52 }
 0x113   :  { %v219_v43 = vmul.f32 %v1090_v51, %v207_v15  ;;  %v170_v38 = vsub.f32 1.5, %v169_v42  ;;  %v189_v49 = vmul.f32 0.5, %v188_v40 }
 0x114   :  { %v1195_v16 = vpop.eup %869  ;;  %v1212_v57 = vadd.f32 %v1131_v7, %v221_v39  ;;  %v1214_v47 = vmin.f32 %v254_v50, 16.0  ;;  %v334_v8 = vmul.f32 %v1236_v41, %v1236_v41 }
 0x115   :  { %v171_v53 = vmul.f32 %v1142_v22, %v170_v38  ;;  %v197_v54 = vmul.f32 %v1195_v16, %v1144_v17  ;;  %v1209_v55 = vadd.f32 %v1131_v7, %v219_v43  ;;  %v190_v63 = vsub.f32 1.5, %v189_v49 }
 0x116   :  { %v256_v0 = vmul.f32 2.1237322e-06, %v1214_v47  ;;  %v267_v1 = vmul.f32 3.8918573e-05, %v1214_v47  ;;  %v1239_v3 = vmul.f32 0.70710677, %v1212_v57  ;;  %vm203_vm9 = vweird.f32 %v1195_v16 }
 0x117   :  { %v198_v58 = vmul.f32 %v1195_v16, %v197_v54  ;;  %v1219_v60 = vmul.f32 0.70710677, %v1209_v55  ;;  %v175_v37 = vsel %vm1224_vm4, %v1142_v22, %v171_v53  ;;  %v1254_v22 = vmul.f32 %v1090_v51, %v211_v61  ;;  %vm1291_vm10 = vmor %vm202_vm6, %vm203_vm9 }
 0x118   :  { %v257_v4 = vadd.f32 0.00028619796, %v256_v0  ;;  %v268_v5 = vadd.f32 0.001143296, %v267_v1  ;;  %v210_v9 = vmul.f32 %v175_v37, %v1003_v44  ;;  %v374_v13 = vmul.f32 %v1239_v3, %v1239_v3 }
 0x119   :  { %v294_v2 = vmul.f32 %v1219_v60, %v1219_v60  ;;  %v199_v6 = vmul.f32 0.5, %v198_v58  ;;  %v191_v14 = vmul.f32 %v1160_v26, %v190_v63  ;;  %v1259_v23 = vmin.f32 %v334_v8, 16.0 }
 0x11a   :  { %v258_v10 = vmul.f32 %v257_v4, %v1214_v47  ;;  %v269_v28 = vmul.f32 %v268_v5, %v1214_v47  ;;  %v1261_v44 = vmin.f32 %v374_v13, 16.0  ;;  %v222_v32 = vmul.f32 %v1090_v51, %v210_v9 }
 0x11b   :  { %v1244_v29 = vmin.f32 %v294_v2, 16.0  ;;  %v200_v27 = vsub.f32 1.5, %v199_v6  ;;  %v336_v35 = vmul.f32 2.1237322e-06, %v1259_v23  ;;  %v347_v36 = vmul.f32 3.8918573e-05, %v1259_v23 }
 0x11c   :  { %v259_v20 = vadd.f32 0.0036580483, %v258_v10  ;;  %v270_v21 = vadd.f32 0.014752088, %v269_v28  ;;  %v376_v42 = vmul.f32 2.1237322e-06, %v1261_v44  ;;  %v195_v39 = vsel %vm1267_vm8, %v1160_v26, %v191_v14 }
 0x11d   :  { %v296_v18 = vmul.f32 2.1237322e-06, %v1244_v29  ;;  %v307_v19 = vmul.f32 3.8918573e-05, %v1244_v29  ;;  %v337_v38 = vadd.f32 0.00028619796, %v336_v35  ;;  %v201_v48 = vmul.f32 %v1195_v16, %v200_v27 }
 0x11e   :  { %v260_v33 = vmul.f32 %v259_v20, %v1214_v47  ;;  %v271_v34 = vmul.f32 %v270_v21, %v1214_v47  ;;  %v348_v53 = vadd.f32 0.001143296, %v347_v36  ;;  %v377_v62 = vadd.f32 0.00028619796, %v376_v42 }
 0x11f   :  { %v297_v30 = vadd.f32 0.00028619796, %v296_v18  ;;  %v308_v12 = vadd.f32 0.001143296, %v307_v19  ;;  %v338_v61 = vmul.f32 %v337_v38, %v1259_v23  ;;  %v387_v37 = vmul.f32 3.8918573e-05, %v1261_v44 }
 0x120   :  { %v261_v40 = vadd.f32 0.05243302, %v260_v33  ;;  %v272_v43 = vadd.f32 0.112945676, %v271_v34  ;;  %v349_v1 = vmul.f32 %v348_v53, %v1259_v23  ;;  %v378_v6 = vmul.f32 %v377_v62, %v1261_v44 }
 0x121   :  { %v298_v15 = vmul.f32 %v297_v30, %v1244_v29  ;;  %v309_v46 = vmul.f32 %v308_v12, %v1244_v29  ;;  %v339_v5 = vadd.f32 0.0036580483, %v338_v61  ;;  %v212_v8 = vmul.f32 %v195_v39, %v1018_v56 }
 0x122   :  { %v262_v54 = vmul.f32 %v261_v40, %v1214_v47  ;;  %v273_v58 = vmul.f32 %v272_v43, %v1214_v47  ;;  %v350_v10 = vadd.f32 0.014752088, %v349_v1  ;;  %v205_v28 = vsel %vm1291_vm10, %v1195_v16, %v201_v48 }
 0x123   :  { %v299_v49 = vadd.f32 0.0036580483, %v298_v15  ;;  %v310_v50 = vadd.f32 0.014752088, %v309_v46  ;;  %v340_v14 = vmul.f32 %v339_v5, %v1259_v23  ;;  %v379_v18 = vadd.f32 0.0036580483, %v378_v6 }
 0x124   :  { %v263_v2 = vadd.f32 0.18741608, %v262_v54  ;;  %v274_v4 = vadd.f32 0.4994258, %v273_v58  ;;  %v351_v21 = vmul.f32 %v350_v10, %v1259_v23  ;;  %v388_v24 = vadd.f32 0.001143296, %v387_v37 }
 0x125   :  { %v300_v63 = vmul.f32 %v299_v49, %v1244_v29  ;;  %v311_v0 = vmul.f32 %v310_v50, %v1244_v29  ;;  %v341_v30 = vadd.f32 0.05243302, %v340_v14  ;;  %v380_v12 = vmul.f32 %v379_v18, %v1261_v44 }
 0x126   :  { %v275_v13 = vmul.f32 %v274_v4, %v1214_v47  ;;  %v264_v56 = vmul.f32 %v263_v2, %v1214_v47  ;;  %v352_v34 = vadd.f32 0.112945676, %v351_v21  ;;  %v389_v35 = vmul.f32 %v388_v24, %v1261_v44 }
 0x127   :  { %v301_v17 = vadd.f32 0.05243302, %v300_v63  ;;  %v312_v9 = vadd.f32 0.112945676, %v311_v0  ;;  %v213_v15 = vmul.f32 %v205_v28, %v1023_v59  ;;  %v1316_v46 = vmul.f32 0.5, %v1170_v31 }
 0x128   :  { %v1310_v27 = vadd.f32 1.0, %v275_v13  ;;  %v1319_v36 = vmul.f32 0.5, %v1209_v55  ;;  %v224_v47 = vmul.f32 %v1090_v51, %v212_v8  ;;  %v342_v39 = vmul.f32 %v341_v30, %v1259_v23 }
 0x129   :  { %v302_v19 = vmul.f32 %v301_v17, %v1244_v29  ;;  %v313_v20 = vmul.f32 %v312_v9, %v1244_v29  ;;  %v1326_v40 = vadd.f32 %v1131_v7, %v222_v32  ;;  %v353_v59 = vmul.f32 %v352_v34, %v1259_v23 }
 0x12a   :  { %871 = vrcp.f32 %v1310_v27  ;;  %v381_v31 = vadd.f32 0.05243302, %v380_v12  ;;  %v390_v38 = vadd.f32 0.014752088, %v389_v35  ;;  %v265_v48 = vadd.f32 1.1283791, %v264_v56 }
 0x12b   :  { %v303_v16 = vadd.f32 0.18741608, %v302_v19  ;;  %v314_v33 = vadd.f32 0.4994258, %v313_v20  ;;  %v343_v49 = vadd.f32 0.18741608, %v342_v39  ;;  %v1334_v50 = vadd.f32 %v1131_v7, %v1254_v22 }
 0x12c   :  { %v1337_v53 = vmul.f32 %v1090_v51, %v213_v15  ;;  %v354_v54 = vadd.f32 0.4994258, %v353_v59  ;;  %v382_v32 = vmul.f32 %v381_v31, %v1261_v44  ;;  %v286_v58 = vand.u32 2147483647, %v1310_v27 }
 0x12d   :  { %v315_v42 = vmul.f32 %v314_v33, %v1244_v29  ;;  %v304_v43 = vmul.f32 %v303_v16, %v1244_v29  ;;  %v391_v29 = vmul.f32 %v390_v38, %v1261_v44  ;;  %v288_v61 = vand.u32 2147483648, %v1310_v27 }
 0x12e   :  { %v1345_v62 = vadd.f32 %v1131_v7, %v224_v47  ;;  %v344_v63 = vmul.f32 %v343_v49, %v1259_v23  ;;  %v355_v51 = vmul.f32 %v354_v54, %v1259_v23  ;;  %v383_v0 = vadd.f32 0.18741608, %v382_v32 }
 0x12f   :  { %v1330_v55 = vadd.f32 1.0, %v315_v42  ;;  %v305_v22 = vadd.f32 1.1283791, %v304_v43  ;;  %v266_v1 = vmul.f32 %v265_v48, %v1191_v45  ;;  %vm282_vm11 = vweird.f32 %v1310_v27 }
 0x130   :  { %v872_v26 = vpop.eup %871  ;;  %v392_v2 = vadd.f32 0.112945676, %v391_v29  ;;  %v345_v6 = vadd.f32 1.1283791, %v344_v63  ;;  %v1354_v8 = vadd.f32 1.0, %v355_v51  ;;  %vm1356_vm12 = vcmp.eq.f32.partialorder %v286_v58, 8.507059e+37 }
 0x131   :  { %873 = vrcp.f32 %v1330_v55  ;;  %v278_v37 = vmul.f32 %v872_v26, %v1310_v27  ;;  %v326_v4 = vand.u32 2147483647, %v1330_v55  ;;  %v328_v5 = vand.u32 2147483648, %v1330_v55 }
 0x132   :  { %v289_v23 = vor.u32 1.1754944e-38, %v288_v61  ;;  %v393_v45 = vmul.f32 %v392_v2, %v1261_v44  ;;  %v306_v10 = vmul.f32 %v305_v22, %v1219_v60  ;;  %875 = vrcp.f32 %v1354_v8 }
 0x133   :  { %v279_v17 = vsub.f32 1.0, %v278_v37  ;;  %v384_v28 = vmul.f32 %v383_v0, %v1261_v44  ;;  %v1365_v13 = vmul.f32 0.70710677, %v1326_v40  ;;  %vm283_vm13 = vweird.f32 %v872_v26 }
 0x134   :  { %vm322_vm14 = vweird.f32 %v1330_v55  ;;  %v394_v19 = vadd.f32 0.4994258, %v393_v45  ;;  %vm1369_vm15 = vcmp.eq.f32.partialorder %v326_v4, 8.507059e+37  ;;  %v329_v60 = vor.u32 1.1754944e-38, %v328_v5  ;;  %vm284_vm1 = vmor %vm282_vm11, %vm283_vm13 }
 0x135   :  { %v280_v18 = vmul.f32 %v872_v26, %v279_v17  ;;  %v1374_v24 = vmul.f32 %v345_v6, %v1236_v41  ;;  %v1377_v56 = vmul.f32 0.70710677, %v1334_v50  ;;  %v366_v12 = vand.u32 2147483647, %v1354_v8 }
 0x136   :  { %v368_v16 = vand.u32 2147483648, %v1354_v8  ;;  %v395_v33 = vmul.f32 %v394_v19, %v1261_v44  ;;  %v385_v35 = vadd.f32 1.1283791, %v384_v28  ;;  %v414_v15 = vmul.f32 %v1365_v13, %v1365_v13 }
 0x137   :  { %v874_v14 = vpop.eup %873  ;;  %v281_v30 = vadd.f32 %v872_v26, %v280_v18  ;;  %v454_v41 = vmul.f32 %v1377_v56, %v1377_v56  ;;  %vm362_vm3 = vweird.f32 %v1354_v8  ;;  %vm1398_vm4 = vcmp.eq.f32.partialorder %v366_v12, 8.507059e+37 }
 0x138   :  { %v318_v20 = vmul.f32 %v874_v14, %v1330_v55  ;;  %vm323_vm2 = vweird.f32 %v874_v14  ;;  %v1389_v42 = vadd.f32 1.0, %v395_v33  ;;  %v876_v39 = vpop.eup %875  ;;  %v1393_v43 = vmin.f32 %v414_v15, 16.0 }
 0x139   :  { %v285_v47 = vsel %vm284_vm1, %v872_v26, %v281_v30  ;;  %v1395_v59 = vmin.f32 %v454_v41, 16.0  ;;  %v358_v38 = vmul.f32 %v876_v39, %v1354_v8  ;;  %v369_v49 = vor.u32 1.1754944e-38, %v368_v16  ;;  %vm324_vm5 = vmor %vm322_vm14, %vm323_vm2 }
 0x13a   :  { %v319_v34 = vsub.f32 1.0, %v318_v20  ;;  %v290_v44 = vsel %vm1356_vm12, %v289_v23, %v285_v47  ;;  %877 = vrcp.f32 %v1389_v42  ;;  %v1404_v32 = vmul.f32 %v385_v35, %v1239_v3 }
 0x13b   :  { %v291_v31 = vmul.f32 %v290_v44, %v266_v1  ;;  %v1408_v29 = vadd.f32 %v1131_v7, %v1337_v53  ;;  %v1411_v58 = vmul.f32 0.70710677, %v1345_v62  ;;  %v359_v26 = vsub.f32 1.0, %v358_v38 }
 0x13c   :  { %v320_v27 = vmul.f32 %v874_v14, %v319_v34  ;;  %v416_v22 = vmul.f32 2.1237322e-06, %v1393_v43  ;;  %v427_v63 = vmul.f32 3.8918573e-05, %v1393_v43  ;;  %vm363_vm6 = vweird.f32 %v876_v39 }
 0x13d   :  { %v791_v61 = vclamps-f32 %v291_v31, 1.0  ;;  %v406_v3 = vand.u32 2147483647, %v1389_v42  ;;  %v456_v7 = vmul.f32 2.1237322e-06, %v1395_v59  ;;  %v360_v1 = vmul.f32 %v876_v39, %v359_v26  ;;  %vm364_vm7 = vmor %vm362_vm3, %vm363_vm6 }
 0x13e   :  { %v321_v54 = vadd.f32 %v874_v14, %v320_v27  ;;  %v417_v37 = vadd.f32 0.00028619796, %v416_v22  ;;  %v428_v55 = vadd.f32 0.001143296, %v427_v63  ;;  %v467_v5 = vmul.f32 3.8918573e-05, %v1395_v59 }
 0x13f   :  { %v574_v0 = vadd.f32 1.0, %v791_v61  ;;  %v457_v4 = vadd.f32 0.00028619796, %v456_v7  ;;  %v361_v9 = vadd.f32 %v876_v39, %v360_v1  ;;  %v408_v23 = vand.u32 2147483648, %v1389_v42 }
 0x140   :  { %v325_v51 = vsel %vm324_vm5, %v874_v14, %v321_v54  ;;  %v878_v6 = vpop.eup %877  ;;  %v418_v45 = vmul.f32 %v417_v37, %v1393_v43  ;;  %v1440_v47 = vmul.f32 0.70710677, %v1408_v29  ;;  %vm402_vm9 = vweird.f32 %v1389_v42 }
 0x141   :  { %v330_v53 = vsel %vm1369_vm15, %v329_v60, %v325_v51  ;;  %v582_v17 = vmul.f32 %v574_v0, %v1316_v46  ;;  %v398_v14 = vmul.f32 %v878_v6, %v1389_v42  ;;  %vm403_vm8 = vweird.f32 %v878_v6 }
 0x142   :  { %v331_v2 = vmul.f32 %v330_v53, %v306_v10  ;;  %v429_v10 = vmul.f32 %v428_v55, %v1393_v43  ;;  %v365_v18 = vsel %vm364_vm7, %v876_v39, %v361_v9  ;;  %v419_v19 = vadd.f32 0.0036580483, %v418_v45  ;;  %vm404_vm11 = vmor %vm402_vm9, %vm403_vm8 }
 0x143   :  { %v458_v20 = vmul.f32 %v457_v4, %v1395_v59  ;;  %v468_v46 = vadd.f32 0.001143296, %v467_v5  ;;  %v370_v60 = vsel %vm1398_vm4, %v369_v49, %v365_v18  ;;  %v399_v30 = vsub.f32 1.0, %v398_v14 }
 0x144   :  { %v792_v28 = vclamps-f32 %v331_v2, 1.0  ;;  %v430_v12 = vadd.f32 0.014752088, %v429_v10  ;;  %v371_v16 = vmul.f32 %v370_v60, %v1374_v24  ;;  %v420_v8 = vmul.f32 %v419_v19, %v1393_v43 }
 0x145   :  { %v459_v33 = vadd.f32 0.0036580483, %v458_v20  ;;  %v469_v34 = vmul.f32 %v468_v46, %v1395_v59  ;;  %v400_v15 = vmul.f32 %v878_v6, %v399_v30  ;;  %vm1443_vm10 = vcmp.eq.f32.partialorder %v406_v3, 8.507059e+37 }
 0x146   :  { %v575_v21 = vadd.f32 1.0, %v792_v28  ;;  %v431_v41 = vmul.f32 %v430_v12, %v1393_v43  ;;  %v421_v24 = vadd.f32 0.05243302, %v420_v8  ;;  %v793_v48 = vclamps-f32 %v371_v16, 1.0 }
 0x147   :  { %v470_v44 = vadd.f32 0.014752088, %v469_v34  ;;  %v401_v31 = vadd.f32 %v878_v6, %v400_v15  ;;  %v409_v49 = vor.u32 1.1754944e-38, %v408_v23  ;;  %v460_v54 = vmul.f32 %v459_v33, %v1395_v59 }
 0x148   :  { %v583_v35 = vmul.f32 %v575_v21, %v1319_v36  ;;  %v432_v38 = vadd.f32 0.112945676, %v431_v41  ;;  %v494_v36 = vmul.f32 %v1411_v58, %v1411_v58  ;;  %v534_v63 = vmul.f32 %v1440_v47, %v1440_v47 }
 0x149   :  { %v471_v42 = vmul.f32 %v470_v44, %v1395_v59  ;;  %v405_v61 = vsel %vm404_vm11, %v878_v6, %v401_v31  ;;  %v422_v7 = vmul.f32 %v421_v24, %v1393_v43  ;;  %v576_v1 = vadd.f32 1.0, %v793_v48 }
 0x14a   :  { %v1447_v27 = vpack.c.bf16 %v583_v35, %v582_v17  ;;  %v433_v26 = vmul.f32 %v432_v38, %v1393_v43  ;;  %v1457_v22 = vmin.f32 %v494_v36, 16.0  ;;  %v410_v51 = vsel %vm1443_vm10, %v409_v49, %v405_v61 }
 0x14b   :  { %v411_v3 = vmul.f32 %v410_v51, %v1404_v32  ;;  %v472_v0 = vadd.f32 0.112945676, %v471_v42  ;;  %v1468_v55 = vmin.f32 %v534_v63, 16.0  ;;  %v461_v6 = vadd.f32 0.05243302, %v460_v54 }
 0x14c   :  { %823 = vmatmul.msk.bf16.vlgmr.msra.gmra.mxu0 %vm30_vm0, %v1447_v27  ;;  %v434_v53 = vadd.f32 0.4994258, %v433_v26  ;;  %v496_v37 = vmul.f32 2.1237322e-06, %v1457_v22  ;;  %v507_v2 = vmul.f32 3.8918573e-05, %v1457_v22 }
 0x14d   :  { %718 = vmatpush.bf16.msra.mxu0 %v1134_v11  ;;  %v794_v4 = vclamps-f32 %v411_v3, 1.0  ;;  %v473_v17 = vmul.f32 %v472_v0, %v1395_v59  ;;  %v240_v11 = vmul.f32 0.5, %v1203_v52  ;;  %v241_v32 = vmul.f32 0.5, %v1212_v57 }
 0x14e   :  { %v435_v5 = vmul.f32 %v434_v53, %v1393_v43  ;;  %v508_v9 = vadd.f32 0.001143296, %v507_v2  ;;  %v423_v45 = vadd.f32 0.18741608, %v422_v7  ;;  %v497_v10 = vadd.f32 0.00028619796, %v496_v37 }
 0x14f   :  { %v577_v23 = vadd.f32 1.0, %v794_v4  ;;  %v474_v14 = vadd.f32 0.4994258, %v473_v17  ;;  %v536_v19 = vmul.f32 2.1237322e-06, %v1468_v55  ;;  %v584_v20 = vmul.f32 %v576_v1, %v240_v11 }
 0x150   :  { %v436_v28 = vadd.f32 1.0, %v435_v5  ;;  %v509_v18 = vmul.f32 %v508_v9, %v1457_v22  ;;  %v462_v21 = vmul.f32 %v461_v6, %v1395_v59  ;;  %v498_v12 = vmul.f32 %v497_v10, %v1457_v22 }
 0x151   :  { %719 = vmatpush.bf16.msra.mxu0 %v1158_v25  ;;  %v585_v46 = vmul.f32 %v577_v23, %v241_v32  ;;  %v475_v52 = vmul.f32 %v474_v14, %v1395_v59  ;;  %v424_v25 = vmul.f32 %v423_v45, %v1393_v43  ;;  %v537_v16 = vadd.f32 0.00028619796, %v536_v19 }
 0x152   :  { %879 = vrcp.f32 %v436_v28  ;;  %v510_v60 = vadd.f32 0.014752088, %v509_v18  ;;  %v547_v8 = vmul.f32 3.8918573e-05, %v1468_v55  ;;  %v463_v33 = vadd.f32 0.18741608, %v462_v21 }
 0x153   :  { %v591_v57 = vpack.c.bf16 %v585_v46, %v584_v20  ;;  %v1480_v30 = vadd.f32 1.0, %v475_v52  ;;  %v425_v35 = vadd.f32 1.1283791, %v424_v25  ;;  %v499_v24 = vadd.f32 0.0036580483, %v498_v12 }
 0x154   :  { %v511_v34 = vmul.f32 %v510_v60, %v1457_v22  ;;  %v548_v41 = vadd.f32 0.001143296, %v547_v8  ;;  %v538_v44 = vmul.f32 %v537_v16, %v1468_v55  ;;  %v464_v31 = vmul.f32 %v463_v33, %v1395_v59 }
 0x155   :  { %824 = vmatmul.msk.bf16.vlgmr.msra.gmra.mxu3 %vm30_vm0, %v591_v57  ;;  %828 = vmatmul.msk.bf16.vlgmr.msra.gmra.mxu1 %vm30_vm0, %v591_v57  ;;  %881 = vrcp.f32 %v1480_v30  ;;  %v446_v49 = vand.u32 2147483647, %v436_v28  ;;  %v448_v54 = vand.u32 2147483648, %v436_v28  ;;  %v426_v42 = vmul.f32 %v425_v35, %v1365_v13 }
 0x156   :  { %832 = vmatmul.msk.bf16.vlgmr.msra.gmra.mxu2 %vm30_vm0, %v591_v57  ;;  %v512_v15 = vadd.f32 0.112945676, %v511_v34  ;;  %v549_v36 = vmul.f32 %v548_v41, %v1468_v55  ;;  %v500_v3 = vmul.f32 %v499_v24, %v1457_v22  ;;  %v539_v59 = vadd.f32 0.0036580483, %v538_v44 }
 0x157   :  { %vm442_vm13 = vweird.f32 %v436_v28  ;;  %v465_v7 = vadd.f32 1.1283791, %v464_v31  ;;  %vm447_vm14 = vcmp.eq.f32.partialorder %v446_v49, 8.507059e+37  ;;  %v449_v37 = vor.u32 1.1754944e-38, %v448_v54 }
 0x158   :  { %v880_v43 = vpop.eup %879  ;;  %v513_v38 = vmul.f32 %v512_v15, %v1457_v22  ;;  %v550_v26 = vadd.f32 0.014752088, %v549_v36  ;;  %v486_v4 = vand.u32 2147483647, %v1480_v30  ;;  %v488_v5 = vand.u32 2147483648, %v1480_v30 }
 0x159   :  { %v438_v39 = vmul.f32 %v880_v43, %v436_v28  ;;  %vm443_vm12 = vweird.f32 %v880_v43  ;;  %v501_v11 = vadd.f32 0.05243302, %v500_v3  ;;  %v540_v32 = vmul.f32 %v539_v59, %v1468_v55 }
 0x15a   :  { %v514_v61 = vadd.f32 0.4994258, %v513_v38  ;;  %v551_v2 = vmul.f32 %v550_v26, %v1468_v55  ;;  %vm444_vm15 = vmor %vm442_vm13, %vm443_vm12  ;;  %vm482_vm2 = vweird.f32 %v1480_v30  ;;  %v466_v19 = vmul.f32 %v465_v7, %v1377_v56 }
 0x15b   :  { %v439_v48 = vsub.f32 1.0, %v438_v39  ;;  %v882_v63 = vpop.eup %881  ;;  %v489_v20 = vor.u32 1.1754944e-38, %v488_v5  ;;  %v502_v46 = vmul.f32 %v501_v11, %v1457_v22  ;;  %vm487_vm4 = vcmp.eq.f32.partialorder %v486_v4, 8.507059e+37 }
 0x15c   :  { %827 = vmatmul.msk.bf16.vlgmr.msrb.gmra.mxu0 %vm30_vm0, %v1447_v27  ;;  %v478_v53 = vmul.f32 %v882_v63, %v1480_v30  ;;  %v515_v0 = vmul.f32 %v514_v61, %v1457_v22  ;;  %v552_v9 = vadd.f32 0.112945676, %v551_v2  ;;  %vm483_vm1 = vweird.f32 %v882_v63 }
 0x15d   :  { %v440_v51 = vmul.f32 %v880_v43, %v439_v48  ;;  %vm484_vm3 = vmor %vm482_vm2, %vm483_vm1  ;;  %v541_v52 = vadd.f32 0.05243302, %v540_v32  ;;  %v503_v30 = vadd.f32 0.18741608, %v502_v46  ;;  %v242_v34 = vmul.f32 0.5, %v1326_v40 }
 0x15e   :  { %v479_v13 = vsub.f32 1.0, %v478_v53  ;;  %v516_v6 = vadd.f32 1.0, %v515_v0  ;;  %v553_v10 = vmul.f32 %v552_v9, %v1468_v55  ;;  %v243_v41 = vmul.f32 0.5, %v1334_v50 }
 0x15f   :  { %v441_v1 = vadd.f32 %v880_v43, %v440_v51  ;;  %v542_v56 = vmul.f32 %v541_v52, %v1468_v55  ;;  %v504_v44 = vmul.f32 %v503_v30, %v1457_v22  ;;  %v244_v11 = vmul.f32 0.5, %v1345_v62 }
 0x160   :  { %v480_v45 = vmul.f32 %v882_v63, %v479_v13  ;;  %883 = vrcp.f32 %v516_v6  ;;  %v554_v57 = vadd.f32 0.4994258, %v553_v10  ;;  %v528_v36 = vand.u32 2147483648, %v516_v6  ;;  %v602_v10 = vld [vmem:[%s1565_s4] sm:$0x7]  ;;  %s914_s4 = smov [#allocation2]  }
 0x161   :  { %v445_v17 = vsel %vm444_vm15, %v880_v43, %v441_v1  ;;  %v543_v40 = vadd.f32 0.18741608, %v542_v56  ;;  %vm522_vm6 = vweird.f32 %v516_v6  ;;  %v526_v49 = vand.u32 2147483647, %v516_v6  ;;  %s777_s9 = sshll.u32 %s914_s4, 4  ;;  %s778_s9 = int_to_ptr.vmem [resolvable:$true] %s777_s9 }
 0x162   :  { %v450_v23 = vsel %vm447_vm14, %v449_v37, %v445_v17  ;;  %v481_v14 = vadd.f32 %v882_v63, %v480_v45  ;;  %v555_v8 = vmul.f32 %v554_v57, %v1468_v55  ;;  %v529_v50 = vor.u32 1.1754944e-38, %v528_v36 }
 0x163   :  { %v451_v28 = vmul.f32 %v450_v23, %v426_v42  ;;  %v505_v42 = vadd.f32 1.1283791, %v504_v44  ;;  %v544_v22 = vmul.f32 %v543_v40, %v1468_v55  ;;  %vm527_vm8 = vcmp.eq.f32.partialorder %v526_v49, 8.507059e+37 }
 0x164   :  { %v485_v21 = vsel %vm484_vm3, %v882_v63, %v481_v14  ;;  %v556_v35 = vadd.f32 1.0, %v555_v8  ;;  %v245_v32 = vmul.f32 0.5, %v1408_v29  ;;  %v1530_v29 = vperm.slane %v602_v10, 1 }
 0x165   :  { %v795_v18 = vclamps-f32 %v451_v28, 1.0  ;;  %v490_v25 = vsel %vm487_vm4, %v489_v20, %v485_v21  ;;  %v506_v51 = vmul.f32 %v505_v42, %v1411_v58  ;;  %v545_v59 = vadd.f32 1.1283791, %v544_v22 }
 0x166   :  { %v884_v60 = vpop.eup %883  ;;  %v491_v12 = vmul.f32 %v490_v25, %v466_v19  ;;  %885 = vrcp.f32 %v556_v35  ;;  %v568_v7 = vand.u32 2147483648, %v556_v35  ;;  %v566_v1 = vand.u32 2147483647, %v556_v35 }
 0x167   :  { %v578_v16 = vadd.f32 1.0, %v795_v18  ;;  %v518_v33 = vmul.f32 %v884_v60, %v516_v6  ;;  %vm523_vm5 = vweird.f32 %v884_v60  ;;  %vm562_vm10 = vweird.f32 %v556_v35 }
 0x168   :  { %v796_v43 = vclamps-f32 %v491_v12, 1.0  ;;  %vm524_vm7 = vmor %vm522_vm6, %vm523_vm5  ;;  %v569_v2 = vor.u32 1.1754944e-38, %v568_v7  ;;  %v546_v55 = vmul.f32 %v545_v59, %v1440_v47  ;;  %vm567_vm12 = vcmp.eq.f32.partialorder %v566_v1, 8.507059e+37 }
 0x169   :  { %v519_v15 = vsub.f32 1.0, %v518_v33  ;;  %v586_v24 = vmul.f32 %v578_v16, %v242_v34  ;;  %v1528_v18 = vperm.slane %v602_v10, 0  ;;  %v1532_v19 = vperm.slane %v602_v10, 2 }
 0x16a   :  { %v579_v39 = vadd.f32 1.0, %v796_v43 }
 0x16b   :  { %v520_v31 = vmul.f32 %v884_v60, %v519_v15 }
 0x16c   :  { %831 = vmatmul.msk.bf16.vlgmr.msra.gmra.mxu0 %vm30_vm0, %v1447_v27  ;;  %v587_v38 = vmul.f32 %v579_v39, %v243_v41  ;;  %v886_v61 = vpop.eup %885 }
 0x16d   :  { %v521_v48 = vadd.f32 %v884_v60, %v520_v31  ;;  %v558_v26 = vmul.f32 %v886_v61, %v556_v35  ;;  %vm563_vm9 = vweird.f32 %v886_v61 }
 0x16e   :  { %v592_v54 = vpack.c.bf16 %v587_v38, %v586_v24  ;;  %vm564_vm11 = vmor %vm562_vm10, %vm563_vm9 }
 0x16f   :  { %v525_v27 = vsel %vm524_vm7, %v884_v60, %v521_v48  ;;  %v559_v3 = vsub.f32 1.0, %v558_v26 }
 0x170   :  { %825 = vmatmul.msk.bf16.gmra.mxu3 %vm30_vm0, %v592_v54  ;;  %829 = vmatmul.msk.bf16.gmra.mxu1 %vm30_vm0, %v592_v54  ;;  %v530_v63 = vsel %vm527_vm8, %v529_v50, %v525_v27 }
 0x171   :  { %833 = vmatmul.msk.bf16.gmra.mxu2 %vm30_vm0, %v592_v54  ;;  %v531_v53 = vmul.f32 %v530_v63, %v506_v51  ;;  %v560_v0 = vmul.f32 %v886_v61, %v559_v3 }
 0x173   :  { %v561_v37 = vadd.f32 %v886_v61, %v560_v0  ;;  %v797_v13 = vclamps-f32 %v531_v53, 1.0 }
 0x175   :  { %v565_v4 = vsel %vm564_vm11, %v886_v61, %v561_v37  ;;  %v580_v58 = vadd.f32 1.0, %v797_v13 }
 0x176   :  { %v570_v5 = vsel %vm567_vm12, %v569_v2, %v565_v4 }
 0x177   :  { %v571_v6 = vmul.f32 %v570_v5, %v546_v55  ;;  %v588_v23 = vmul.f32 %v580_v58, %v244_v11 }
 0x179   :  { %v798_v17 = vclamps-f32 %v571_v6, 1.0 }
 0x17b   :  { %v581_v9 = vadd.f32 1.0, %v798_v17 }
 0x17d   :  { %v589_v45 = vmul.f32 %v581_v9, %v245_v32 }
 0x17f   :  { %v593_v28 = vpack.c.bf16 %v589_v45, %v588_v23 }
 0x181   :  { %826 = vmatmul.msk.bf16.gmra.mxu3 %vm30_vm0, %v593_v28  ;;  %830 = vmatmul.msk.bf16.gmra.mxu1 %vm30_vm0, %v593_v28 }
 0x182   :  { %834 = vmatmul.msk.bf16.gmra.mxu2 %vm30_vm0, %v593_v28 }
 0x1c9   :  { %v663_v47 = vpop.f32.mrf.mxu0 }
 0x1ca   :  { %v664_v46 = vadd.f32 %v663_v47, %v1528_v18 }
 0x1d1   :  { %v665_v14 = vpop.f32.mrf.mxu0 }
 0x1d2   :  { %v697_v62 = vpop.f32.mrf.mxu1  ;;  %v666_v43 = vadd.f32 %v665_v14, %v1528_v18 }
 0x1d3   :  { %v698_v57 = vadd.f32 %v697_v62, %v1530_v29 }
 0x1d8   :  { %v668_v52 = vpop.f32.mrf.mxu3 }
 0x1d9   :  { %v692_v20 = vpop.f32.mrf.mxu0  ;;  %v669_v25 = vadd.f32 %v668_v52, %v1528_v18  ;;  %v726_v60 = vpop.f32.mrf.mxu2 }
 0x1da   :  { %v693_v21 = vadd.f32 %v692_v20, %v1530_v29  ;;  %v727_v16 = vadd.f32 %v726_v60, %v1532_v19  ;;  %v699_v33 = vpop.f32.mrf.mxu1 }
 0x1db   :  { %v745_v8 = vpack.c.bf16 %v698_v57, %v669_v25  ;;  %v700_v15 = vadd.f32 %v699_v33, %v1530_v29 }
 0x1dc   :  { %v741_v12 = vpack.c.bf16 %v693_v21, %v664_v46  ;;  %v746_v30 = vpack.c.bf16 %v727_v16, %v727_v16 }
 0x1dd   :  { %761 = vst [vmem:[#allocation2 + $0x18] sm:$0xff] %v745_v8 }
 0x1de   :  { %757 = vst [vmem:[#allocation2] sm:$0xff] %v741_v12 }
 0x1df   :  { %762 = vst [vmem:[#allocation2 + $0x20] sm:$0xf] %v746_v30 }
 0x1e0   :  { %v670_v35 = vpop.f32.mrf.mxu3 }
 0x1e1   :  { %v694_v34 = vpop.f32.mrf.mxu0  ;;  %v671_v41 = vadd.f32 %v670_v35, %v1528_v18  ;;  %v728_v39 = vpop.f32.mrf.mxu2 }
 0x1e2   :  { %v695_v56 = vadd.f32 %v694_v34, %v1530_v29  ;;  %v729_v44 = vadd.f32 %v728_v39, %v1532_v19 }
 0x1e3   :  { %v747_v31 = vpack.c.bf16 %v700_v15, %v671_v41 }
 0x1e4   :  { %v743_v24 = vpack.c.bf16 %v695_v56, %v666_v43  ;;  %v748_v38 = vpack.c.bf16 %v729_v44, %v729_v44 }
 0x1e5   :  { %763 = vst [vmem:[#allocation2 + $0x24] sm:$0xff] %v747_v31 }
 0x1e6   :  { %759 = vst [vmem:[#allocation2 + $0xc] sm:$0xff] %v743_v24 }
 0x1e7   :  { %764 = vst [vmem:[#allocation2 + $0x2c] sm:$0xf] %v748_v38 }
 0x1e9   :  { %v721_v36 = vpop.f32.mrf.mxu0 }
 0x1ea   :  { %v722_v40 = vadd.f32 %v721_v36, %v1532_v19 }
 0x1ec   :  { %v742_v48 = vpack.c.bf16 %v722_v40, %v722_v40 }
 0x1ed   :  { %v702_v54 = vpop.f32.mrf.mxu1 }
 0x1ee   :  { %758 = vst [vmem:[#allocation2 + $0x8] sm:$0xf] %v742_v48  ;;  %v703_v50 = vadd.f32 %v702_v54, %v1530_v29 }
 0x1f1   :  { %v723_v49 = vpop.f32.mrf.mxu0 }
 0x1f2   :  { %v724_v42 = vadd.f32 %v723_v49, %v1532_v19 }
 0x1f3   :  { %v673_v61 = vpop.f32.mrf.mxu3 }
 0x1f4   :  { %v744_v27 = vpack.c.bf16 %v724_v42, %v724_v42  ;;  %v674_v22 = vadd.f32 %v673_v61, %v1528_v18  ;;  %v731_v26 = vpop.f32.mrf.mxu2 }
 0x1f5   :  { %v732_v63 = vadd.f32 %v731_v26, %v1532_v19  ;;  %v704_v59 = vpop.f32.mrf.mxu1 }
 0x1f6   :  { %760 = vst [vmem:[#allocation2 + $0x14] sm:$0xf] %v744_v27  ;;  %v749_v51 = vpack.c.bf16 %v703_v50, %v674_v22  ;;  %v705_v53 = vadd.f32 %v704_v59, %v1530_v29 }
 0x1f7   :  { %v750_v3 = vpack.c.bf16 %v732_v63, %v732_v63 }
 0x1f8   :  { %765 = vst [vmem:[#allocation2 + $0x30] sm:$0xff] %v749_v51 }
 0x1f9   :  { %766 = vst [vmem:[#allocation2 + $0x38] sm:$0xf] %v750_v3 }
 0x1fb   :  { %v675_v7 = vpop.f32.mrf.mxu3 }
 0x1fc   :  { %v676_v0 = vadd.f32 %v675_v7, %v1528_v18  ;;  %v733_v1 = vpop.f32.mrf.mxu2 }
 0x1fd   :  { %v734_v37 = vadd.f32 %v733_v1, %v1532_v19 }
 0x1fe   :  { %v751_v2 = vpack.c.bf16 %v705_v53, %v676_v0  ;;  %v707_v55 = vpop.f32.mrf.mxu1 }
 0x1ff   :  { %v752_v13 = vpack.c.bf16 %v734_v37, %v734_v37  ;;  %v708_v5 = vadd.f32 %v707_v55, %v1530_v29 }
 0x200   :  { %767 = vst [vmem:[#allocation2 + $0x3c] sm:$0xff] %v751_v2 }
 0x201   :  { %768 = vst [vmem:[#allocation2 + $0x44] sm:$0xf] %v752_v13 }
 0x204   :  { %v678_v4 = vpop.f32.mrf.mxu3 }
 0x205   :  { %v679_v6 = vadd.f32 %v678_v4, %v1528_v18  ;;  %v736_v17 = vpop.f32.mrf.mxu2 }
 0x206   :  { %v737_v58 = vadd.f32 %v736_v17, %v1532_v19  ;;  %v709_v9 = vpop.f32.mrf.mxu1 }
 0x207   :  { %v753_v11 = vpack.c.bf16 %v708_v5, %v679_v6  ;;  %v710_v45 = vadd.f32 %v709_v9, %v1530_v29 }
 0x208   :  { %v754_v32 = vpack.c.bf16 %v737_v58, %v737_v58 }
 0x209   :  { %769 = vst [vmem:[#allocation2 + $0x48] sm:$0xff] %v753_v11 }
 0x20a   :  { %770 = vst [vmem:[#allocation2 + $0x50] sm:$0xf] %v754_v32 }
 0x20c   :  { %v680_v23 = vpop.f32.mrf.mxu3 }
 0x20d   :  { %v681_v28 = vadd.f32 %v680_v23, %v1528_v18  ;;  %v738_v47 = vpop.f32.mrf.mxu2 }
 0x20e   :  { %v739_v14 = vadd.f32 %v738_v47, %v1532_v19 }
 0x20f   :  { %v755_v10 = vpack.c.bf16 %v710_v45, %v681_v28 }
 0x210   :  { %v756_v62 = vpack.c.bf16 %v739_v14, %v739_v14 }
 0x211   :  { %771 = vst [vmem:[#allocation2 + $0x54] sm:$0xff] %v755_v10 }
 0x212   :  { %772 = vst [vmem:[#allocation2 + $0x5c] sm:$0xf] %v756_v62 }
 0x213   :  { %785 = dma.vmem_to_hbm [thread:$0]  %s778_s9, 1536, %s780_s12, [#allocation3], %s915_s13, %s915_s13, %s916_s14  }
 0x214   :  { %911 = dma.done.wait [#allocation3], 1536  }
 0x215   :  { %912 = vsyncadd [#allocation3], 4294965760 }
 0x216   :  { %790 = vsyncpa [#allocation3], 1 }

</bundles_post_ra>
